<compile_context>
chip_gen: v7x
topology: tpu7x:2x2x1
jax: 0.10.0
libtpu: 0.0.40
codegen_flags: <defaults>
</compile_context>

<pallas_src>
import jax
import jax.numpy as jnp
from jax.experimental import pallas as pl
from jax.experimental.pallas import tpu as pltpu

# ----- module hyper-parameters (from the PyTorch script) -----
hidden_size = 3
input_size = 1
num_classes = 1
num_layers = 2   # hard-coded as two explicit layers inside the kernel
seq_length = 4
batch_size = 2

_G = 4 * hidden_size   # fused gate width (i, f, g, o)
_B_TILE = 16           # max sequences handled per grid point


# Packed parameter slab layout (rows x 4H), all f32.  The g-gate columns
# (2H:3H) of every LSTM weight/bias row are pre-scaled by 2 (see cell()).
#   row 0                 : 2-scaled(g) w_ih_l0^T            (I == 1 -> 1 row)
#   row 1                 : 2-scaled(g) (b_ih_l0 + b_hh_l0)
#   rows 2      .. 2+H-1  : 2-scaled(g) w_hh_l0^T            (H, 4H)
#   rows 2+H    .. 2+2H-1 : 2-scaled(g) w_ih_l1^T            (H, 4H)
#   rows 2+2H   .. 2+3H-1 : 2-scaled(g) w_hh_l1^T            (H, 4H)
#   row 2+3H              : 2-scaled(g) (b_ih_l1 + b_hh_l1)
#   rows 3+3H .. 3+3H+C-1 : per-class FC row = [fc_w[c, :H], fc_b[c], 0...]
#                           (NOT scaled)
def _slab_rows():
    return 3 + 3 * hidden_size + num_classes


def _lstm_fc_kernel(x_ref, p_ref, out_ref):
    H = hidden_size
    G = _G
    C = num_classes
    B = x_ref.shape[1]       # batch tile
    T = x_ref.shape[2]

    # ---- load all parameters ONCE; they stay resident in vregs ----
    P = p_ref[...]                               # (3+3H+C, 4H) f32
    wi0 = P[0:1, :]                              # (1, 4H)
    b0 = P[1:2, :]                               # (1, 4H)
    wh0 = P[2:2 + H, :]                          # (H, 4H)
    wi1 = P[2 + H:2 + 2 * H, :]                  # (H, 4H)
    wh1 = P[2 + 2 * H:2 + 3 * H, :]              # (H, 4H)
    b1 = P[2 + 3 * H:3 + 3 * H, :]               # (1, 4H)
    fc = P[3 + 3 * H:, :]                        # (C, 4H) (unscaled)

    # ---- hoisted layer-0 input projection for all T steps (off crit path) --
    x = x_ref[0].astype(jnp.float32)             # (B, T)
    xproj = x[:, :, None] * wi0[:, None, :] + b0[:, None, :]   # (B, T, 4H)

    def mac(h, w):
        # (B, H) x (H, 4H) -> (B, 4H) as H unrolled VPU broadcast MACs
        # (avoids MXU push/pop latency on the serial recurrence).
        acc = h[:, 0:1] * w[0:1, :]
        for k in range(1, H):
            acc = acc + h[:, k:k + 1] * w[k:k + 1, :]
        return acc

    def cell(pre, c):
        # pre: fused pre-activation, gate order i,f,g,o along lanes.
        # g columns of the weights/bias were pre-scaled by 2, so a single
        # sigmoid covers all four gates: tanh(g_pre) = 2*sigmoid(2*g_pre) - 1.
        sg = jax.nn.sigmoid(pre)                 # one EUP pass, all gates
        i = sg[:, 0:H]
        f = sg[:, H:2 * H]
        g = 2.0 * sg[:, 2 * H:3 * H] - 1.0
        o = sg[:, 3 * H:4 * H]
        c_new = f * c + i * g
        h_new = o * jnp.tanh(c_new)              # second (and last) EUP pass
        return h_new, c_new

    zeros = jnp.zeros((B, H), jnp.float32)
    h0, c0 = zeros, zeros
    h1, c1 = zeros, zeros

    # ---- layer wavefront (statically unrolled): wave w computes layer-0
    # step w and layer-1 step w-1 with ONE stacked (2B, 4H) cell. ----
    for w in range(T + 1):
        # layer-1 step w-1: input is the layer-0 output from the previous
        # wave, which is exactly the current value of h0.
        pre1 = b1 + mac(h0, wi1) + mac(h1, wh1)
        if w < T:
            pre0 = xproj[:, w, :] + mac(h0, wh0)
            pre = jnp.concatenate([pre0, pre1], axis=0)     # (2B, 4H)
            c_in = jnp.concatenate([c0, c1], axis=0)        # (2B, H)
            hh, cc = cell(pre, c_in)
            h0, c0 = hh[:B, :], cc[:B, :]
            h1_new, c1_new = hh[B:, :], cc[B:, :]
        else:
            # last wave: only layer-1 (step T-1) remains
            h1_new, c1_new = cell(pre1, c1)
        if w == 0:
            h1, c1 = zeros, zeros    # layer-1 has not started yet; discard
        else:
            h1, c1 = h1_new, c1_new

    # ---- Linear head on the VPU/XLU: out[:, c] = h1 @ fc_w[c] + fc_b[c] ----
    for ci in range(C):
        row = fc[ci:ci + 1, :]                   # (1, 4H)
        out_ref[:, ci:ci + 1] = (
            jnp.sum(h1 * row[:, 0:H], axis=-1, keepdims=True)
            + row[:, H:H + 1])


def lstm_forward(x, packed_params, loop_cnt=0):
    """Pallas equivalent of LSTM.forward(x, loop_cnt).

    x: [batch, seq_length, input_size]; packed_params: output of pack_params.
    Any batch size is folded into one pallas_call via a "parallel" grid axis
    over batch tiles of up to _B_TILE sequences.
    """
    del loop_cnt  # only controls a debug print in the PyTorch module
    B, T, I = x.shape
    assert I == input_size == 1
    assert packed_params.shape == (_slab_rows(), _G)

    if B <= _B_TILE:
        b_tile, nb, b_pad = B, 1, B
    else:
        b_tile = _B_TILE
        nb = pl.cdiv(B, b_tile)
        b_pad = nb * b_tile

    xr = x[:, :, 0]                              # (B, T): squeeze lane-1 dim
    if b_pad != B:
        xr = jnp.pad(xr, ((0, b_pad - B), (0, 0)))
    xr = xr.reshape(nb, b_tile, T)               # one lane-dense tile / point

    out = pl.pallas_call(
        _lstm_fc_kernel,
        out_shape=jax.ShapeDtypeStruct((b_pad, num_classes), jnp.float32),
        grid=(nb,),
        in_specs=[
            pl.BlockSpec((1, b_tile, T), lambda i: (i, 0, 0)),
            # constant block index -> slab DMA'd once, revisited thereafter
            pl.BlockSpec((_slab_rows(), _G), lambda i: (0, 0)),
        ],
        out_specs=pl.BlockSpec((b_tile, num_classes), lambda i: (i, 0)),
        compiler_params=pltpu.CompilerParams(
            dimension_semantics=("parallel",)),
    )(xr, packed_params)
    return out[:B]


def init_params(key):
    """PyTorch-default init: every tensor ~ U(-1/sqrt(H), 1/sqrt(H)),
    with separate b_ih / b_hh draws (matches nn.LSTM / nn.Linear)."""
    H, I, C = hidden_size, input_size, num_classes
    bound = 1.0 / (H ** 0.5)
    ks = jax.random.split(key, 10)

    def u(k, shape):
        return jax.random.uniform(k, shape, jnp.float32, -bound, bound)

    return {
        "w_ih_l0": u(ks[0], (4 * H, I)),
        "w_hh_l0": u(ks[1], (4 * H, H)),
        "b_ih_l0": u(ks[2], (4 * H,)),
        "b_hh_l0": u(ks[3], (4 * H,)),
        "w_ih_l1": u(ks[4], (4 * H, H)),
        "w_hh_l1": u(ks[5], (4 * H, H)),
        "b_ih_l1": u(ks[6], (4 * H,)),
        "b_hh_l1": u(ks[7], (4 * H,)),
        "fc_w": u(ks[8], (C, H)),
        "fc_b": u(ks[9], (C,)),
    }


def pack_params(p):
    """Pack all 10 PyTorch-layout tensors into one lane-dense f32 slab.

    The g-gate (i,f,g,o order -> columns 2H:3H) of every LSTM weight/bias is
    scaled by 2 so the kernel can fold tanh into the fused sigmoid.  The FC
    rows are NOT scaled.
    """
    H, C, G = hidden_size, num_classes, _G
    gscale = jnp.concatenate([
        jnp.ones((2 * H,), jnp.float32),
        jnp.full((H,), 2.0, jnp.float32),
        jnp.ones((H,), jnp.float32),
    ])                                                     # (4H,)
    fc_rows = jnp.zeros((C, G), jnp.float32)
    fc_rows = fc_rows.at[:, :H].set(p["fc_w"])
    fc_rows = fc_rows.at[:, H:H + 1].set(p["fc_b"][:, None])
    slab = jnp.concatenate([
        p["w_ih_l0"].T.reshape(input_size, G) * gscale,        # row 0
        ((p["b_ih_l0"] + p["b_hh_l0"]) * gscale).reshape(1, G),  # row 1
        p["w_hh_l0"].T * gscale,                               # rows 2..
        p["w_ih_l1"].T * gscale,                               # rows 2+H..
        p["w_hh_l1"].T * gscale,                               # rows 2+2H..
        ((p["b_ih_l1"] + p["b_hh_l1"]) * gscale).reshape(1, G),  # row 2+3H
        fc_rows,                                               # rows 3+3H..
    ], axis=0)
    assert slab.shape == (_slab_rows(), G)
    return slab


def lstm_forward_ref(x, p):
    """Pure-JAX reference in PyTorch layout, for a correctness check."""
    H = hidden_size
    B = x.shape[0]

    def cell(x_t, h, c, w_ih, w_hh, b_ih, b_hh):
        gates = x_t @ w_ih.T + b_ih + h @ w_hh.T + b_hh   # (B, 4H)
        i = jax.nn.sigmoid(gates[:, 0:H])
        f = jax.nn.sigmoid(gates[:, H:2 * H])
        g = jnp.tanh(gates[:, 2 * H:3 * H])
        o = jax.nn.sigmoid(gates[:, 3 * H:4 * H])
        c_new = f * c + i * g
        return o * jnp.tanh(c_new), c_new

    h0 = c0 = h1 = c1 = jnp.zeros((B, H), jnp.float32)
    for t in range(x.shape[1]):
        x_t = x[:, t, :]
        h0, c0 = cell(x_t, h0, c0, p["w_ih_l0"], p["w_hh_l0"],
                      p["b_ih_l0"], p["b_hh_l0"])
        h1, c1 = cell(h0, h1, c1, p["w_ih_l1"], p["w_hh_l1"],
                      p["b_ih_l1"], p["b_hh_l1"])
    return h1 @ p["fc_w"].T + p["fc_b"]


if __name__ == "__main__":
    key = jax.random.PRNGKey(0)
    k_x, k_p, k_x2 = jax.random.split(key, 3)

    params = init_params(k_p)
    slab = pack_params(params)

    # --- primary check: module shapes [batch, seq_length, input_size] = [2,4,1]
    x = jax.random.normal(k_x, (batch_size, seq_length, input_size), jnp.float32)
    out = jax.block_until_ready(lstm_forward(x, slab, loop_cnt=1))
    ref = lstm_forward_ref(x, params)
    assert out.shape == (batch_size, num_classes)
    assert jnp.allclose(out, ref, atol=1e-5, rtol=1e-5), (out, ref)

    # --- secondary check: many sequences folded into one call (grid path,
    #     batch padding + "parallel" axis exercised).
    x_big = jax.random.normal(k_x2, (40, seq_length, input_size), jnp.float32)
    out_big = jax.block_until_ready(lstm_forward(x_big, slab, loop_cnt=0))
    ref_big = lstm_forward_ref(x_big, params)
    assert out_big.shape == (40, num_classes)
    assert jnp.allclose(out_big, ref_big, atol=1e-5, rtol=1e-5)

    print("KERNEL_OK")
</pallas_src>

<mosaic_0001>
module attributes {stable_mosaic.version = 11 : i64} {
  func.func @_lstm_fc_kernel(%arg0: i32, %arg1: memref<1x2x4xf32, #tpu.memory_space<vmem>>, %arg2: memref<13x12xf32, #tpu.memory_space<vmem>>, %arg3: memref<2x1xf32, #tpu.memory_space<vmem>>) attributes {dimension_semantics = [#tpu.dimension_semantics<parallel>], iteration_bounds = array<i64: 1>, scalar_prefetch = 0 : i64, scratch_operands = 0 : i64, tpu.core_type = #tpu.core_type<tc>, window_params = [{transform_indices = @transform_0, window_bounds = array<i64: 1, 2, 4>}, {pipeline_mode = #tpu.pipeline_mode<synchronous>, transform_indices = @transform_1, window_bounds = array<i64: 13, 12>}, {transform_indices = @transform_2, window_bounds = array<i64: 2, 1>}]} {
    %c0 = arith.constant 0 : index
    %c0_0 = arith.constant 0 : index
    %0 = vector.load %arg2[%c0, %c0_0] : memref<13x12xf32, #tpu.memory_space<vmem>>, vector<13x12xf32>
    %1 = vector.extract_strided_slice %0 {offsets = [0, 0], sizes = [1, 12], strides = [1, 1]} : vector<13x12xf32> to vector<1x12xf32>
    %2 = vector.extract_strided_slice %0 {offsets = [1, 0], sizes = [1, 12], strides = [1, 1]} : vector<13x12xf32> to vector<1x12xf32>
    %3 = vector.extract_strided_slice %0 {offsets = [2, 0], sizes = [3, 12], strides = [1, 1]} : vector<13x12xf32> to vector<3x12xf32>
    %4 = vector.extract_strided_slice %0 {offsets = [5, 0], sizes = [3, 12], strides = [1, 1]} : vector<13x12xf32> to vector<3x12xf32>
    %5 = vector.extract_strided_slice %0 {offsets = [8, 0], sizes = [3, 12], strides = [1, 1]} : vector<13x12xf32> to vector<3x12xf32>
    %6 = vector.extract_strided_slice %0 {offsets = [11, 0], sizes = [1, 12], strides = [1, 1]} : vector<13x12xf32> to vector<1x12xf32>
    %7 = vector.extract_strided_slice %0 {offsets = [12, 0], sizes = [1, 12], strides = [1, 1]} : vector<13x12xf32> to vector<1x12xf32>
    %c0_1 = arith.constant 0 : index
    %c0_2 = arith.constant 0 : index
    %c0_3 = arith.constant 0 : index
    %8 = vector.load %arg1[%c0_1, %c0_2, %c0_3] : memref<1x2x4xf32, #tpu.memory_space<vmem>>, vector<1x2x4xf32>
    %9 = vector.shape_cast %8 : vector<1x2x4xf32> to vector<2x4xf32>
    %10 = vector.shape_cast %9 : vector<2x4xf32> to vector<2x4x1xf32>
    %11 = vector.shape_cast %1 : vector<1x12xf32> to vector<1x1x12xf32>
    %12 = vector.broadcast %10 : vector<2x4x1xf32> to vector<2x4x12xf32>
    %13 = vector.broadcast %11 : vector<1x1x12xf32> to vector<2x4x12xf32>
    %14 = arith.mulf %12, %13 : vector<2x4x12xf32>
    %15 = vector.shape_cast %2 : vector<1x12xf32> to vector<1x1x12xf32>
    %16 = vector.broadcast %15 : vector<1x1x12xf32> to vector<2x4x12xf32>
    %17 = arith.addf %14, %16 : vector<2x4x12xf32>
    %cst = arith.constant 0.000000e+00 : f32
    %18 = vector.broadcast %cst : f32 to vector<2x3xf32>
    %19 = vector.extract_strided_slice %18 {offsets = [0, 0], sizes = [2, 1], strides = [1, 1]} : vector<2x3xf32> to vector<2x1xf32>
    %20 = vector.extract_strided_slice %4 {offsets = [0, 0], sizes = [1, 12], strides = [1, 1]} : vector<3x12xf32> to vector<1x12xf32>
    %21 = vector.broadcast %19 : vector<2x1xf32> to vector<2x12xf32>
    %22 = vector.broadcast %20 : vector<1x12xf32> to vector<2x12xf32>
    %23 = arith.mulf %21, %22 : vector<2x12xf32>
    %24 = vector.extract_strided_slice %18 {offsets = [0, 1], sizes = [2, 1], strides = [1, 1]} : vector<2x3xf32> to vector<2x1xf32>
    %25 = vector.extract_strided_slice %4 {offsets = [1, 0], sizes = [1, 12], strides = [1, 1]} : vector<3x12xf32> to vector<1x12xf32>
    %26 = vector.broadcast %24 : vector<2x1xf32> to vector<2x12xf32>
    %27 = vector.broadcast %25 : vector<1x12xf32> to vector<2x12xf32>
    %28 = arith.mulf %26, %27 : vector<2x12xf32>
    %29 = arith.addf %23, %28 : vector<2x12xf32>
    %30 = vector.extract_strided_slice %18 {offsets = [0, 2], sizes = [2, 1], strides = [1, 1]} : vector<2x3xf32> to vector<2x1xf32>
    %31 = vector.extract_strided_slice %4 {offsets = [2, 0], sizes = [1, 12], strides = [1, 1]} : vector<3x12xf32> to vector<1x12xf32>
    %32 = vector.broadcast %30 : vector<2x1xf32> to vector<2x12xf32>
    %33 = vector.broadcast %31 : vector<1x12xf32> to vector<2x12xf32>
    %34 = arith.mulf %32, %33 : vector<2x12xf32>
    %35 = arith.addf %29, %34 : vector<2x12xf32>
    %36 = vector.broadcast %6 : vector<1x12xf32> to vector<2x12xf32>
    %37 = arith.addf %36, %35 : vector<2x12xf32>
    %38 = vector.extract_strided_slice %18 {offsets = [0, 0], sizes = [2, 1], strides = [1, 1]} : vector<2x3xf32> to vector<2x1xf32>
    %39 = vector.extract_strided_slice %5 {offsets = [0, 0], sizes = [1, 12], strides = [1, 1]} : vector<3x12xf32> to vector<1x12xf32>
    %40 = vector.broadcast %38 : vector<2x1xf32> to vector<2x12xf32>
    %41 = vector.broadcast %39 : vector<1x12xf32> to vector<2x12xf32>
    %42 = arith.mulf %40, %41 : vector<2x12xf32>
    %43 = vector.extract_strided_slice %18 {offsets = [0, 1], sizes = [2, 1], strides = [1, 1]} : vector<2x3xf32> to vector<2x1xf32>
    %44 = vector.extract_strided_slice %5 {offsets = [1, 0], sizes = [1, 12], strides = [1, 1]} : vector<3x12xf32> to vector<1x12xf32>
    %45 = vector.broadcast %43 : vector<2x1xf32> to vector<2x12xf32>
    %46 = vector.broadcast %44 : vector<1x12xf32> to vector<2x12xf32>
    %47 = arith.mulf %45, %46 : vector<2x12xf32>
    %48 = arith.addf %42, %47 : vector<2x12xf32>
    %49 = vector.extract_strided_slice %18 {offsets = [0, 2], sizes = [2, 1], strides = [1, 1]} : vector<2x3xf32> to vector<2x1xf32>
    %50 = vector.extract_strided_slice %5 {offsets = [2, 0], sizes = [1, 12], strides = [1, 1]} : vector<3x12xf32> to vector<1x12xf32>
    %51 = vector.broadcast %49 : vector<2x1xf32> to vector<2x12xf32>
    %52 = vector.broadcast %50 : vector<1x12xf32> to vector<2x12xf32>
    %53 = arith.mulf %51, %52 : vector<2x12xf32>
    %54 = arith.addf %48, %53 : vector<2x12xf32>
    %55 = arith.addf %37, %54 : vector<2x12xf32>
    %56 = vector.extract_strided_slice %17 {offsets = [0, 0, 0], sizes = [2, 1, 12], strides = [1, 1, 1]} : vector<2x4x12xf32> to vector<2x1x12xf32>
    %57 = vector.shape_cast %56 : vector<2x1x12xf32> to vector<2x12xf32>
    %58 = vector.extract_strided_slice %18 {offsets = [0, 0], sizes = [2, 1], strides = [1, 1]} : vector<2x3xf32> to vector<2x1xf32>
    %59 = vector.extract_strided_slice %3 {offsets = [0, 0], sizes = [1, 12], strides = [1, 1]} : vector<3x12xf32> to vector<1x12xf32>
    %60 = vector.broadcast %58 : vector<2x1xf32> to vector<2x12xf32>
    %61 = vector.broadcast %59 : vector<1x12xf32> to vector<2x12xf32>
    %62 = arith.mulf %60, %61 : vector<2x12xf32>
    %63 = vector.extract_strided_slice %18 {offsets = [0, 1], sizes = [2, 1], strides = [1, 1]} : vector<2x3xf32> to vector<2x1xf32>
    %64 = vector.extract_strided_slice %3 {offsets = [1, 0], sizes = [1, 12], strides = [1, 1]} : vector<3x12xf32> to vector<1x12xf32>
    %65 = vector.broadcast %63 : vector<2x1xf32> to vector<2x12xf32>
    %66 = vector.broadcast %64 : vector<1x12xf32> to vector<2x12xf32>
    %67 = arith.mulf %65, %66 : vector<2x12xf32>
    %68 = arith.addf %62, %67 : vector<2x12xf32>
    %69 = vector.extract_strided_slice %18 {offsets = [0, 2], sizes = [2, 1], strides = [1, 1]} : vector<2x3xf32> to vector<2x1xf32>
    %70 = vector.extract_strided_slice %3 {offsets = [2, 0], sizes = [1, 12], strides = [1, 1]} : vector<3x12xf32> to vector<1x12xf32>
    %71 = vector.broadcast %69 : vector<2x1xf32> to vector<2x12xf32>
    %72 = vector.broadcast %70 : vector<1x12xf32> to vector<2x12xf32>
    %73 = arith.mulf %71, %72 : vector<2x12xf32>
    %74 = arith.addf %68, %73 : vector<2x12xf32>
    %75 = arith.addf %57, %74 : vector<2x12xf32>
    %76 = tpu.concatenate %75, %55 in 0 : vector<2x12xf32>, vector<2x12xf32> -> vector<4x12xf32>
    %77 = tpu.concatenate %18, %18 in 0 : vector<2x3xf32>, vector<2x3xf32> -> vector<4x3xf32>
    %78 = arith.negf %76 : vector<4x12xf32>
    %79 = math.exp %78 : vector<4x12xf32>
    %cst_4 = arith.constant 1.000000e+00 : f32
    %80 = vector.broadcast %cst_4 : f32 to vector<4x12xf32>
    %81 = arith.addf %80, %79 : vector<4x12xf32>
    %82 = arith.divf %80, %81 : vector<4x12xf32>
    %83 = vector.extract_strided_slice %82 {offsets = [0, 0], sizes = [4, 3], strides = [1, 1]} : vector<4x12xf32> to vector<4x3xf32>
    %84 = vector.extract_strided_slice %82 {offsets = [0, 3], sizes = [4, 3], strides = [1, 1]} : vector<4x12xf32> to vector<4x3xf32>
    %85 = vector.extract_strided_slice %82 {offsets = [0, 6], sizes = [4, 3], strides = [1, 1]} : vector<4x12xf32> to vector<4x3xf32>
    %cst_5 = arith.constant 2.000000e+00 : f32
    %86 = vector.broadcast %cst_5 : f32 to vector<4x3xf32>
    %87 = arith.mulf %86, %85 : vector<4x3xf32>
    %cst_6 = arith.constant 1.000000e+00 : f32
    %88 = vector.broadcast %cst_6 : f32 to vector<4x3xf32>
    %89 = arith.subf %87, %88 : vector<4x3xf32>
    %90 = vector.extract_strided_slice %82 {offsets = [0, 9], sizes = [4, 3], strides = [1, 1]} : vector<4x12xf32> to vector<4x3xf32>
    %91 = arith.mulf %84, %77 : vector<4x3xf32>
    %92 = arith.mulf %83, %89 : vector<4x3xf32>
    %93 = arith.addf %91, %92 : vector<4x3xf32>
    %94 = math.tanh %93 : vector<4x3xf32>
    %95 = arith.mulf %90, %94 : vector<4x3xf32>
    %96 = vector.extract_strided_slice %95 {offsets = [0, 0], sizes = [2, 3], strides = [1, 1]} : vector<4x3xf32> to vector<2x3xf32>
    %97 = vector.extract_strided_slice %93 {offsets = [0, 0], sizes = [2, 3], strides = [1, 1]} : vector<4x3xf32> to vector<2x3xf32>
    %98 = vector.extract_strided_slice %96 {offsets = [0, 0], sizes = [2, 1], strides = [1, 1]} : vector<2x3xf32> to vector<2x1xf32>
    %99 = vector.extract_strided_slice %4 {offsets = [0, 0], sizes = [1, 12], strides = [1, 1]} : vector<3x12xf32> to vector<1x12xf32>
    %100 = vector.broadcast %98 : vector<2x1xf32> to vector<2x12xf32>
    %101 = vector.broadcast %99 : vector<1x12xf32> to vector<2x12xf32>
    %102 = arith.mulf %100, %101 : vector<2x12xf32>
    %103 = vector.extract_strided_slice %96 {offsets = [0, 1], sizes = [2, 1], strides = [1, 1]} : vector<2x3xf32> to vector<2x1xf32>
    %104 = vector.extract_strided_slice %4 {offsets = [1, 0], sizes = [1, 12], strides = [1, 1]} : vector<3x12xf32> to vector<1x12xf32>
    %105 = vector.broadcast %103 : vector<2x1xf32> to vector<2x12xf32>
    %106 = vector.broadcast %104 : vector<1x12xf32> to vector<2x12xf32>
    %107 = arith.mulf %105, %106 : vector<2x12xf32>
    %108 = arith.addf %102, %107 : vector<2x12xf32>
    %109 = vector.extract_strided_slice %96 {offsets = [0, 2], sizes = [2, 1], strides = [1, 1]} : vector<2x3xf32> to vector<2x1xf32>
    %110 = vector.extract_strided_slice %4 {offsets = [2, 0], sizes = [1, 12], strides = [1, 1]} : vector<3x12xf32> to vector<1x12xf32>
    %111 = vector.broadcast %109 : vector<2x1xf32> to vector<2x12xf32>
    %112 = vector.broadcast %110 : vector<1x12xf32> to vector<2x12xf32>
    %113 = arith.mulf %111, %112 : vector<2x12xf32>
    %114 = arith.addf %108, %113 : vector<2x12xf32>
    %115 = vector.broadcast %6 : vector<1x12xf32> to vector<2x12xf32>
    %116 = arith.addf %115, %114 : vector<2x12xf32>
    %117 = vector.extract_strided_slice %18 {offsets = [0, 0], sizes = [2, 1], strides = [1, 1]} : vector<2x3xf32> to vector<2x1xf32>
    %118 = vector.extract_strided_slice %5 {offsets = [0, 0], sizes = [1, 12], strides = [1, 1]} : vector<3x12xf32> to vector<1x12xf32>
    %119 = vector.broadcast %117 : vector<2x1xf32> to vector<2x12xf32>
    %120 = vector.broadcast %118 : vector<1x12xf32> to vector<2x12xf32>
    %121 = arith.mulf %119, %120 : vector<2x12xf32>
    %122 = vector.extract_strided_slice %18 {offsets = [0, 1], sizes = [2, 1], strides = [1, 1]} : vector<2x3xf32> to vector<2x1xf32>
    %123 = vector.extract_strided_slice %5 {offsets = [1, 0], sizes = [1, 12], strides = [1, 1]} : vector<3x12xf32> to vector<1x12xf32>
    %124 = vector.broadcast %122 : vector<2x1xf32> to vector<2x12xf32>
    %125 = vector.broadcast %123 : vector<1x12xf32> to vector<2x12xf32>
    %126 = arith.mulf %124, %125 : vector<2x12xf32>
    %127 = arith.addf %121, %126 : vector<2x12xf32>
    %128 = vector.extract_strided_slice %18 {offsets = [0, 2], sizes = [2, 1], strides = [1, 1]} : vector<2x3xf32> to vector<2x1xf32>
    %129 = vector.extract_strided_slice %5 {offsets = [2, 0], sizes = [1, 12], strides = [1, 1]} : vector<3x12xf32> to vector<1x12xf32>
    %130 = vector.broadcast %128 : vector<2x1xf32> to vector<2x12xf32>
    %131 = vector.broadcast %129 : vector<1x12xf32> to vector<2x12xf32>
    %132 = arith.mulf %130, %131 : vector<2x12xf32>
    %133 = arith.addf %127, %132 : vector<2x12xf32>
    %134 = arith.addf %116, %133 : vector<2x12xf32>
    %135 = vector.extract_strided_slice %17 {offsets = [0, 1, 0], sizes = [2, 1, 12], strides = [1, 1, 1]} : vector<2x4x12xf32> to vector<2x1x12xf32>
    %136 = vector.shape_cast %135 : vector<2x1x12xf32> to vector<2x12xf32>
    %137 = vector.extract_strided_slice %96 {offsets = [0, 0], sizes = [2, 1], strides = [1, 1]} : vector<2x3xf32> to vector<2x1xf32>
    %138 = vector.extract_strided_slice %3 {offsets = [0, 0], sizes = [1, 12], strides = [1, 1]} : vector<3x12xf32> to vector<1x12xf32>
    %139 = vector.broadcast %137 : vector<2x1xf32> to vector<2x12xf32>
    %140 = vector.broadcast %138 : vector<1x12xf32> to vector<2x12xf32>
    %141 = arith.mulf %139, %140 : vector<2x12xf32>
    %142 = vector.extract_strided_slice %96 {offsets = [0, 1], sizes = [2, 1], strides = [1, 1]} : vector<2x3xf32> to vector<2x1xf32>
    %143 = vector.extract_strided_slice %3 {offsets = [1, 0], sizes = [1, 12], strides = [1, 1]} : vector<3x12xf32> to vector<1x12xf32>
    %144 = vector.broadcast %142 : vector<2x1xf32> to vector<2x12xf32>
    %145 = vector.broadcast %143 : vector<1x12xf32> to vector<2x12xf32>
    %146 = arith.mulf %144, %145 : vector<2x12xf32>
    %147 = arith.addf %141, %146 : vector<2x12xf32>
    %148 = vector.extract_strided_slice %96 {offsets = [0, 2], sizes = [2, 1], strides = [1, 1]} : vector<2x3xf32> to vector<2x1xf32>
    %149 = vector.extract_strided_slice %3 {offsets = [2, 0], sizes = [1, 12], strides = [1, 1]} : vector<3x12xf32> to vector<1x12xf32>
    %150 = vector.broadcast %148 : vector<2x1xf32> to vector<2x12xf32>
    %151 = vector.broadcast %149 : vector<1x12xf32> to vector<2x12xf32>
    %152 = arith.mulf %150, %151 : vector<2x12xf32>
    %153 = arith.addf %147, %152 : vector<2x12xf32>
    %154 = arith.addf %136, %153 : vector<2x12xf32>
    %155 = tpu.concatenate %154, %134 in 0 : vector<2x12xf32>, vector<2x12xf32> -> vector<4x12xf32>
    %156 = tpu.concatenate %97, %18 in 0 : vector<2x3xf32>, vector<2x3xf32> -> vector<4x3xf32>
    %157 = arith.negf %155 : vector<4x12xf32>
    %158 = math.exp %157 : vector<4x12xf32>
    %cst_7 = arith.constant 1.000000e+00 : f32
    %159 = vector.broadcast %cst_7 : f32 to vector<4x12xf32>
    %160 = arith.addf %159, %158 : vector<4x12xf32>
    %161 = arith.divf %159, %160 : vector<4x12xf32>
    %162 = vector.extract_strided_slice %161 {offsets = [0, 0], sizes = [4, 3], strides = [1, 1]} : vector<4x12xf32> to vector<4x3xf32>
    %163 = vector.extract_strided_slice %161 {offsets = [0, 3], sizes = [4, 3], strides = [1, 1]} : vector<4x12xf32> to vector<4x3xf32>
    %164 = vector.extract_strided_slice %161 {offsets = [0, 6], sizes = [4, 3], strides = [1, 1]} : vector<4x12xf32> to vector<4x3xf32>
    %cst_8 = arith.constant 2.000000e+00 : f32
    %165 = vector.broadcast %cst_8 : f32 to vector<4x3xf32>
    %166 = arith.mulf %165, %164 : vector<4x3xf32>
    %cst_9 = arith.constant 1.000000e+00 : f32
    %167 = vector.broadcast %cst_9 : f32 to vector<4x3xf32>
    %168 = arith.subf %166, %167 : vector<4x3xf32>
    %169 = vector.extract_strided_slice %161 {offsets = [0, 9], sizes = [4, 3], strides = [1, 1]} : vector<4x12xf32> to vector<4x3xf32>
    %170 = arith.mulf %163, %156 : vector<4x3xf32>
    %171 = arith.mulf %162, %168 : vector<4x3xf32>
    %172 = arith.addf %170, %171 : vector<4x3xf32>
    %173 = math.tanh %172 : vector<4x3xf32>
    %174 = arith.mulf %169, %173 : vector<4x3xf32>
    %175 = vector.extract_strided_slice %174 {offsets = [0, 0], sizes = [2, 3], strides = [1, 1]} : vector<4x3xf32> to vector<2x3xf32>
    %176 = vector.extract_strided_slice %172 {offsets = [0, 0], sizes = [2, 3], strides = [1, 1]} : vector<4x3xf32> to vector<2x3xf32>
    %177 = vector.extract_strided_slice %174 {offsets = [2, 0], sizes = [2, 3], strides = [1, 1]} : vector<4x3xf32> to vector<2x3xf32>
    %178 = vector.extract_strided_slice %172 {offsets = [2, 0], sizes = [2, 3], strides = [1, 1]} : vector<4x3xf32> to vector<2x3xf32>
    %179 = vector.extract_strided_slice %175 {offsets = [0, 0], sizes = [2, 1], strides = [1, 1]} : vector<2x3xf32> to vector<2x1xf32>
    %180 = vector.extract_strided_slice %4 {offsets = [0, 0], sizes = [1, 12], strides = [1, 1]} : vector<3x12xf32> to vector<1x12xf32>
    %181 = vector.broadcast %179 : vector<2x1xf32> to vector<2x12xf32>
    %182 = vector.broadcast %180 : vector<1x12xf32> to vector<2x12xf32>
    %183 = arith.mulf %181, %182 : vector<2x12xf32>
    %184 = vector.extract_strided_slice %175 {offsets = [0, 1], sizes = [2, 1], strides = [1, 1]} : vector<2x3xf32> to vector<2x1xf32>
    %185 = vector.extract_strided_slice %4 {offsets = [1, 0], sizes = [1, 12], strides = [1, 1]} : vector<3x12xf32> to vector<1x12xf32>
    %186 = vector.broadcast %184 : vector<2x1xf32> to vector<2x12xf32>
    %187 = vector.broadcast %185 : vector<1x12xf32> to vector<2x12xf32>
    %188 = arith.mulf %186, %187 : vector<2x12xf32>
    %189 = arith.addf %183, %188 : vector<2x12xf32>
    %190 = vector.extract_strided_slice %175 {offsets = [0, 2], sizes = [2, 1], strides = [1, 1]} : vector<2x3xf32> to vector<2x1xf32>
    %191 = vector.extract_strided_slice %4 {offsets = [2, 0], sizes = [1, 12], strides = [1, 1]} : vector<3x12xf32> to vector<1x12xf32>
    %192 = vector.broadcast %190 : vector<2x1xf32> to vector<2x12xf32>
    %193 = vector.broadcast %191 : vector<1x12xf32> to vector<2x12xf32>
    %194 = arith.mulf %192, %193 : vector<2x12xf32>
    %195 = arith.addf %189, %194 : vector<2x12xf32>
    %196 = vector.broadcast %6 : vector<1x12xf32> to vector<2x12xf32>
    %197 = arith.addf %196, %195 : vector<2x12xf32>
    %198 = vector.extract_strided_slice %177 {offsets = [0, 0], sizes = [2, 1], strides = [1, 1]} : vector<2x3xf32> to vector<2x1xf32>
    %199 = vector.extract_strided_slice %5 {offsets = [0, 0], sizes = [1, 12], strides = [1, 1]} : vector<3x12xf32> to vector<1x12xf32>
    %200 = vector.broadcast %198 : vector<2x1xf32> to vector<2x12xf32>
    %201 = vector.broadcast %199 : vector<1x12xf32> to vector<2x12xf32>
    %202 = arith.mulf %200, %201 : vector<2x12xf32>
    %203 = vector.extract_strided_slice %177 {offsets = [0, 1], sizes = [2, 1], strides = [1, 1]} : vector<2x3xf32> to vector<2x1xf32>
    %204 = vector.extract_strided_slice %5 {offsets = [1, 0], sizes = [1, 12], strides = [1, 1]} : vector<3x12xf32> to vector<1x12xf32>
    %205 = vector.broadcast %203 : vector<2x1xf32> to vector<2x12xf32>
    %206 = vector.broadcast %204 : vector<1x12xf32> to vector<2x12xf32>
    %207 = arith.mulf %205, %206 : vector<2x12xf32>
    %208 = arith.addf %202, %207 : vector<2x12xf32>
    %209 = vector.extract_strided_slice %177 {offsets = [0, 2], sizes = [2, 1], strides = [1, 1]} : vector<2x3xf32> to vector<2x1xf32>
    %210 = vector.extract_strided_slice %5 {offsets = [2, 0], sizes = [1, 12], strides = [1, 1]} : vector<3x12xf32> to vector<1x12xf32>
    %211 = vector.broadcast %209 : vector<2x1xf32> to vector<2x12xf32>
    %212 = vector.broadcast %210 : vector<1x12xf32> to vector<2x12xf32>
    %213 = arith.mulf %211, %212 : vector<2x12xf32>
    %214 = arith.addf %208, %213 : vector<2x12xf32>
    %215 = arith.addf %197, %214 : vector<2x12xf32>
    %216 = vector.extract_strided_slice %17 {offsets = [0, 2, 0], sizes = [2, 1, 12], strides = [1, 1, 1]} : vector<2x4x12xf32> to vector<2x1x12xf32>
    %217 = vector.shape_cast %216 : vector<2x1x12xf32> to vector<2x12xf32>
    %218 = vector.extract_strided_slice %175 {offsets = [0, 0], sizes = [2, 1], strides = [1, 1]} : vector<2x3xf32> to vector<2x1xf32>
    %219 = vector.extract_strided_slice %3 {offsets = [0, 0], sizes = [1, 12], strides = [1, 1]} : vector<3x12xf32> to vector<1x12xf32>
    %220 = vector.broadcast %218 : vector<2x1xf32> to vector<2x12xf32>
    %221 = vector.broadcast %219 : vector<1x12xf32> to vector<2x12xf32>
    %222 = arith.mulf %220, %221 : vector<2x12xf32>
    %223 = vector.extract_strided_slice %175 {offsets = [0, 1], sizes = [2, 1], strides = [1, 1]} : vector<2x3xf32> to vector<2x1xf32>
    %224 = vector.extract_strided_slice %3 {offsets = [1, 0], sizes = [1, 12], strides = [1, 1]} : vector<3x12xf32> to vector<1x12xf32>
    %225 = vector.broadcast %223 : vector<2x1xf32> to vector<2x12xf32>
    %226 = vector.broadcast %224 : vector<1x12xf32> to vector<2x12xf32>
    %227 = arith.mulf %225, %226 : vector<2x12xf32>
    %228 = arith.addf %222, %227 : vector<2x12xf32>
    %229 = vector.extract_strided_slice %175 {offsets = [0, 2], sizes = [2, 1], strides = [1, 1]} : vector<2x3xf32> to vector<2x1xf32>
    %230 = vector.extract_strided_slice %3 {offsets = [2, 0], sizes = [1, 12], strides = [1, 1]} : vector<3x12xf32> to vector<1x12xf32>
    %231 = vector.broadcast %229 : vector<2x1xf32> to vector<2x12xf32>
    %232 = vector.broadcast %230 : vector<1x12xf32> to vector<2x12xf32>
    %233 = arith.mulf %231, %232 : vector<2x12xf32>
    %234 = arith.addf %228, %233 : vector<2x12xf32>
    %235 = arith.addf %217, %234 : vector<2x12xf32>
    %236 = tpu.concatenate %235, %215 in 0 : vector<2x12xf32>, vector<2x12xf32> -> vector<4x12xf32>
    %237 = tpu.concatenate %176, %178 in 0 : vector<2x3xf32>, vector<2x3xf32> -> vector<4x3xf32>
    %238 = arith.negf %236 : vector<4x12xf32>
    %239 = math.exp %238 : vector<4x12xf32>
    %cst_10 = arith.constant 1.000000e+00 : f32
    %240 = vector.broadcast %cst_10 : f32 to vector<4x12xf32>
    %241 = arith.addf %240, %239 : vector<4x12xf32>
    %242 = arith.divf %240, %241 : vector<4x12xf32>
    %243 = vector.extract_strided_slice %242 {offsets = [0, 0], sizes = [4, 3], strides = [1, 1]} : vector<4x12xf32> to vector<4x3xf32>
    %244 = vector.extract_strided_slice %242 {offsets = [0, 3], sizes = [4, 3], strides = [1, 1]} : vector<4x12xf32> to vector<4x3xf32>
    %245 = vector.extract_strided_slice %242 {offsets = [0, 6], sizes = [4, 3], strides = [1, 1]} : vector<4x12xf32> to vector<4x3xf32>
    %cst_11 = arith.constant 2.000000e+00 : f32
    %246 = vector.broadcast %cst_11 : f32 to vector<4x3xf32>
    %247 = arith.mulf %246, %245 : vector<4x3xf32>
    %cst_12 = arith.constant 1.000000e+00 : f32
    %248 = vector.broadcast %cst_12 : f32 to vector<4x3xf32>
    %249 = arith.subf %247, %248 : vector<4x3xf32>
    %250 = vector.extract_strided_slice %242 {offsets = [0, 9], sizes = [4, 3], strides = [1, 1]} : vector<4x12xf32> to vector<4x3xf32>
    %251 = arith.mulf %244, %237 : vector<4x3xf32>
    %252 = arith.mulf %243, %249 : vector<4x3xf32>
    %253 = arith.addf %251, %252 : vector<4x3xf32>
    %254 = math.tanh %253 : vector<4x3xf32>
    %255 = arith.mulf %250, %254 : vector<4x3xf32>
    %256 = vector.extract_strided_slice %255 {offsets = [0, 0], sizes = [2, 3], strides = [1, 1]} : vector<4x3xf32> to vector<2x3xf32>
    %257 = vector.extract_strided_slice %253 {offsets = [0, 0], sizes = [2, 3], strides = [1, 1]} : vector<4x3xf32> to vector<2x3xf32>
    %258 = vector.extract_strided_slice %255 {offsets = [2, 0], sizes = [2, 3], strides = [1, 1]} : vector<4x3xf32> to vector<2x3xf32>
    %259 = vector.extract_strided_slice %253 {offsets = [2, 0], sizes = [2, 3], strides = [1, 1]} : vector<4x3xf32> to vector<2x3xf32>
    %260 = vector.extract_strided_slice %256 {offsets = [0, 0], sizes = [2, 1], strides = [1, 1]} : vector<2x3xf32> to vector<2x1xf32>
    %261 = vector.extract_strided_slice %4 {offsets = [0, 0], sizes = [1, 12], strides = [1, 1]} : vector<3x12xf32> to vector<1x12xf32>
    %262 = vector.broadcast %260 : vector<2x1xf32> to vector<2x12xf32>
    %263 = vector.broadcast %261 : vector<1x12xf32> to vector<2x12xf32>
    %264 = arith.mulf %262, %263 : vector<2x12xf32>
    %265 = vector.extract_strided_slice %256 {offsets = [0, 1], sizes = [2, 1], strides = [1, 1]} : vector<2x3xf32> to vector<2x1xf32>
    %266 = vector.extract_strided_slice %4 {offsets = [1, 0], sizes = [1, 12], strides = [1, 1]} : vector<3x12xf32> to vector<1x12xf32>
    %267 = vector.broadcast %265 : vector<2x1xf32> to vector<2x12xf32>
    %268 = vector.broadcast %266 : vector<1x12xf32> to vector<2x12xf32>
    %269 = arith.mulf %267, %268 : vector<2x12xf32>
    %270 = arith.addf %264, %269 : vector<2x12xf32>
    %271 = vector.extract_strided_slice %256 {offsets = [0, 2], sizes = [2, 1], strides = [1, 1]} : vector<2x3xf32> to vector<2x1xf32>
    %272 = vector.extract_strided_slice %4 {offsets = [2, 0], sizes = [1, 12], strides = [1, 1]} : vector<3x12xf32> to vector<1x12xf32>
    %273 = vector.broadcast %271 : vector<2x1xf32> to vector<2x12xf32>
    %274 = vector.broadcast %272 : vector<1x12xf32> to vector<2x12xf32>
    %275 = arith.mulf %273, %274 : vector<2x12xf32>
    %276 = arith.addf %270, %275 : vector<2x12xf32>
    %277 = vector.broadcast %6 : vector<1x12xf32> to vector<2x12xf32>
    %278 = arith.addf %277, %276 : vector<2x12xf32>
    %279 = vector.extract_strided_slice %258 {offsets = [0, 0], sizes = [2, 1], strides = [1, 1]} : vector<2x3xf32> to vector<2x1xf32>
    %280 = vector.extract_strided_slice %5 {offsets = [0, 0], sizes = [1, 12], strides = [1, 1]} : vector<3x12xf32> to vector<1x12xf32>
    %281 = vector.broadcast %279 : vector<2x1xf32> to vector<2x12xf32>
    %282 = vector.broadcast %280 : vector<1x12xf32> to vector<2x12xf32>
    %283 = arith.mulf %281, %282 : vector<2x12xf32>
    %284 = vector.extract_strided_slice %258 {offsets = [0, 1], sizes = [2, 1], strides = [1, 1]} : vector<2x3xf32> to vector<2x1xf32>
    %285 = vector.extract_strided_slice %5 {offsets = [1, 0], sizes = [1, 12], strides = [1, 1]} : vector<3x12xf32> to vector<1x12xf32>
    %286 = vector.broadcast %284 : vector<2x1xf32> to vector<2x12xf32>
    %287 = vector.broadcast %285 : vector<1x12xf32> to vector<2x12xf32>
    %288 = arith.mulf %286, %287 : vector<2x12xf32>
    %289 = arith.addf %283, %288 : vector<2x12xf32>
    %290 = vector.extract_strided_slice %258 {offsets = [0, 2], sizes = [2, 1], strides = [1, 1]} : vector<2x3xf32> to vector<2x1xf32>
    %291 = vector.extract_strided_slice %5 {offsets = [2, 0], sizes = [1, 12], strides = [1, 1]} : vector<3x12xf32> to vector<1x12xf32>
    %292 = vector.broadcast %290 : vector<2x1xf32> to vector<2x12xf32>
    %293 = vector.broadcast %291 : vector<1x12xf32> to vector<2x12xf32>
    %294 = arith.mulf %292, %293 : vector<2x12xf32>
    %295 = arith.addf %289, %294 : vector<2x12xf32>
    %296 = arith.addf %278, %295 : vector<2x12xf32>
    %297 = vector.extract_strided_slice %17 {offsets = [0, 3, 0], sizes = [2, 1, 12], strides = [1, 1, 1]} : vector<2x4x12xf32> to vector<2x1x12xf32>
    %298 = vector.shape_cast %297 : vector<2x1x12xf32> to vector<2x12xf32>
    %299 = vector.extract_strided_slice %256 {offsets = [0, 0], sizes = [2, 1], strides = [1, 1]} : vector<2x3xf32> to vector<2x1xf32>
    %300 = vector.extract_strided_slice %3 {offsets = [0, 0], sizes = [1, 12], strides = [1, 1]} : vector<3x12xf32> to vector<1x12xf32>
    %301 = vector.broadcast %299 : vector<2x1xf32> to vector<2x12xf32>
    %302 = vector.broadcast %300 : vector<1x12xf32> to vector<2x12xf32>
    %303 = arith.mulf %301, %302 : vector<2x12xf32>
    %304 = vector.extract_strided_slice %256 {offsets = [0, 1], sizes = [2, 1], strides = [1, 1]} : vector<2x3xf32> to vector<2x1xf32>
    %305 = vector.extract_strided_slice %3 {offsets = [1, 0], sizes = [1, 12], strides = [1, 1]} : vector<3x12xf32> to vector<1x12xf32>
    %306 = vector.broadcast %304 : vector<2x1xf32> to vector<2x12xf32>
    %307 = vector.broadcast %305 : vector<1x12xf32> to vector<2x12xf32>
    %308 = arith.mulf %306, %307 : vector<2x12xf32>
    %309 = arith.addf %303, %308 : vector<2x12xf32>
    %310 = vector.extract_strided_slice %256 {offsets = [0, 2], sizes = [2, 1], strides = [1, 1]} : vector<2x3xf32> to vector<2x1xf32>
    %311 = vector.extract_strided_slice %3 {offsets = [2, 0], sizes = [1, 12], strides = [1, 1]} : vector<3x12xf32> to vector<1x12xf32>
    %312 = vector.broadcast %310 : vector<2x1xf32> to vector<2x12xf32>
    %313 = vector.broadcast %311 : vector<1x12xf32> to vector<2x12xf32>
    %314 = arith.mulf %312, %313 : vector<2x12xf32>
    %315 = arith.addf %309, %314 : vector<2x12xf32>
    %316 = arith.addf %298, %315 : vector<2x12xf32>
    %317 = tpu.concatenate %316, %296 in 0 : vector<2x12xf32>, vector<2x12xf32> -> vector<4x12xf32>
    %318 = tpu.concatenate %257, %259 in 0 : vector<2x3xf32>, vector<2x3xf32> -> vector<4x3xf32>
    %319 = arith.negf %317 : vector<4x12xf32>
    %320 = math.exp %319 : vector<4x12xf32>
    %cst_13 = arith.constant 1.000000e+00 : f32
    %321 = vector.broadcast %cst_13 : f32 to vector<4x12xf32>
    %322 = arith.addf %321, %320 : vector<4x12xf32>
    %323 = arith.divf %321, %322 : vector<4x12xf32>
    %324 = vector.extract_strided_slice %323 {offsets = [0, 0], sizes = [4, 3], strides = [1, 1]} : vector<4x12xf32> to vector<4x3xf32>
    %325 = vector.extract_strided_slice %323 {offsets = [0, 3], sizes = [4, 3], strides = [1, 1]} : vector<4x12xf32> to vector<4x3xf32>
    %326 = vector.extract_strided_slice %323 {offsets = [0, 6], sizes = [4, 3], strides = [1, 1]} : vector<4x12xf32> to vector<4x3xf32>
    %cst_14 = arith.constant 2.000000e+00 : f32
    %327 = vector.broadcast %cst_14 : f32 to vector<4x3xf32>
    %328 = arith.mulf %327, %326 : vector<4x3xf32>
    %cst_15 = arith.constant 1.000000e+00 : f32
    %329 = vector.broadcast %cst_15 : f32 to vector<4x3xf32>
    %330 = arith.subf %328, %329 : vector<4x3xf32>
    %331 = vector.extract_strided_slice %323 {offsets = [0, 9], sizes = [4, 3], strides = [1, 1]} : vector<4x12xf32> to vector<4x3xf32>
    %332 = arith.mulf %325, %318 : vector<4x3xf32>
    %333 = arith.mulf %324, %330 : vector<4x3xf32>
    %334 = arith.addf %332, %333 : vector<4x3xf32>
    %335 = math.tanh %334 : vector<4x3xf32>
    %336 = arith.mulf %331, %335 : vector<4x3xf32>
    %337 = vector.extract_strided_slice %336 {offsets = [0, 0], sizes = [2, 3], strides = [1, 1]} : vector<4x3xf32> to vector<2x3xf32>
    %338 = vector.extract_strided_slice %336 {offsets = [2, 0], sizes = [2, 3], strides = [1, 1]} : vector<4x3xf32> to vector<2x3xf32>
    %339 = vector.extract_strided_slice %334 {offsets = [2, 0], sizes = [2, 3], strides = [1, 1]} : vector<4x3xf32> to vector<2x3xf32>
    %340 = vector.extract_strided_slice %337 {offsets = [0, 0], sizes = [2, 1], strides = [1, 1]} : vector<2x3xf32> to vector<2x1xf32>
    %341 = vector.extract_strided_slice %4 {offsets = [0, 0], sizes = [1, 12], strides = [1, 1]} : vector<3x12xf32> to vector<1x12xf32>
    %342 = vector.broadcast %340 : vector<2x1xf32> to vector<2x12xf32>
    %343 = vector.broadcast %341 : vector<1x12xf32> to vector<2x12xf32>
    %344 = arith.mulf %342, %343 : vector<2x12xf32>
    %345 = vector.extract_strided_slice %337 {offsets = [0, 1], sizes = [2, 1], strides = [1, 1]} : vector<2x3xf32> to vector<2x1xf32>
    %346 = vector.extract_strided_slice %4 {offsets = [1, 0], sizes = [1, 12], strides = [1, 1]} : vector<3x12xf32> to vector<1x12xf32>
    %347 = vector.broadcast %345 : vector<2x1xf32> to vector<2x12xf32>
    %348 = vector.broadcast %346 : vector<1x12xf32> to vector<2x12xf32>
    %349 = arith.mulf %347, %348 : vector<2x12xf32>
    %350 = arith.addf %344, %349 : vector<2x12xf32>
    %351 = vector.extract_strided_slice %337 {offsets = [0, 2], sizes = [2, 1], strides = [1, 1]} : vector<2x3xf32> to vector<2x1xf32>
    %352 = vector.extract_strided_slice %4 {offsets = [2, 0], sizes = [1, 12], strides = [1, 1]} : vector<3x12xf32> to vector<1x12xf32>
    %353 = vector.broadcast %351 : vector<2x1xf32> to vector<2x12xf32>
    %354 = vector.broadcast %352 : vector<1x12xf32> to vector<2x12xf32>
    %355 = arith.mulf %353, %354 : vector<2x12xf32>
    %356 = arith.addf %350, %355 : vector<2x12xf32>
    %357 = vector.broadcast %6 : vector<1x12xf32> to vector<2x12xf32>
    %358 = arith.addf %357, %356 : vector<2x12xf32>
    %359 = vector.extract_strided_slice %338 {offsets = [0, 0], sizes = [2, 1], strides = [1, 1]} : vector<2x3xf32> to vector<2x1xf32>
    %360 = vector.extract_strided_slice %5 {offsets = [0, 0], sizes = [1, 12], strides = [1, 1]} : vector<3x12xf32> to vector<1x12xf32>
    %361 = vector.broadcast %359 : vector<2x1xf32> to vector<2x12xf32>
    %362 = vector.broadcast %360 : vector<1x12xf32> to vector<2x12xf32>
    %363 = arith.mulf %361, %362 : vector<2x12xf32>
    %364 = vector.extract_strided_slice %338 {offsets = [0, 1], sizes = [2, 1], strides = [1, 1]} : vector<2x3xf32> to vector<2x1xf32>
    %365 = vector.extract_strided_slice %5 {offsets = [1, 0], sizes = [1, 12], strides = [1, 1]} : vector<3x12xf32> to vector<1x12xf32>
    %366 = vector.broadcast %364 : vector<2x1xf32> to vector<2x12xf32>
    %367 = vector.broadcast %365 : vector<1x12xf32> to vector<2x12xf32>
    %368 = arith.mulf %366, %367 : vector<2x12xf32>
    %369 = arith.addf %363, %368 : vector<2x12xf32>
    %370 = vector.extract_strided_slice %338 {offsets = [0, 2], sizes = [2, 1], strides = [1, 1]} : vector<2x3xf32> to vector<2x1xf32>
    %371 = vector.extract_strided_slice %5 {offsets = [2, 0], sizes = [1, 12], strides = [1, 1]} : vector<3x12xf32> to vector<1x12xf32>
    %372 = vector.broadcast %370 : vector<2x1xf32> to vector<2x12xf32>
    %373 = vector.broadcast %371 : vector<1x12xf32> to vector<2x12xf32>
    %374 = arith.mulf %372, %373 : vector<2x12xf32>
    %375 = arith.addf %369, %374 : vector<2x12xf32>
    %376 = arith.addf %358, %375 : vector<2x12xf32>
    %377 = arith.negf %376 : vector<2x12xf32>
    %378 = math.exp %377 : vector<2x12xf32>
    %cst_16 = arith.constant 1.000000e+00 : f32
    %379 = vector.broadcast %cst_16 : f32 to vector<2x12xf32>
    %380 = arith.addf %379, %378 : vector<2x12xf32>
    %381 = arith.divf %379, %380 : vector<2x12xf32>
    %382 = vector.extract_strided_slice %381 {offsets = [0, 0], sizes = [2, 3], strides = [1, 1]} : vector<2x12xf32> to vector<2x3xf32>
    %383 = vector.extract_strided_slice %381 {offsets = [0, 3], sizes = [2, 3], strides = [1, 1]} : vector<2x12xf32> to vector<2x3xf32>
    %384 = vector.extract_strided_slice %381 {offsets = [0, 6], sizes = [2, 3], strides = [1, 1]} : vector<2x12xf32> to vector<2x3xf32>
    %cst_17 = arith.constant 2.000000e+00 : f32
    %385 = vector.broadcast %cst_17 : f32 to vector<2x3xf32>
    %386 = arith.mulf %385, %384 : vector<2x3xf32>
    %cst_18 = arith.constant 1.000000e+00 : f32
    %387 = vector.broadcast %cst_18 : f32 to vector<2x3xf32>
    %388 = arith.subf %386, %387 : vector<2x3xf32>
    %389 = vector.extract_strided_slice %381 {offsets = [0, 9], sizes = [2, 3], strides = [1, 1]} : vector<2x12xf32> to vector<2x3xf32>
    %390 = arith.mulf %383, %339 : vector<2x3xf32>
    %391 = arith.mulf %382, %388 : vector<2x3xf32>
    %392 = arith.addf %390, %391 : vector<2x3xf32>
    %393 = math.tanh %392 : vector<2x3xf32>
    %394 = arith.mulf %389, %393 : vector<2x3xf32>
    %395 = vector.extract_strided_slice %7 {offsets = [0, 0], sizes = [1, 3], strides = [1, 1]} : vector<1x12xf32> to vector<1x3xf32>
    %396 = vector.broadcast %395 : vector<1x3xf32> to vector<2x3xf32>
    %397 = arith.mulf %394, %396 : vector<2x3xf32>
    %cst_19 = arith.constant dense<0.000000e+00> : vector<2xf32>
    %398 = vector.multi_reduction <add>, %397, %cst_19 [1] : vector<2x3xf32> to vector<2xf32>
    %399 = vector.shape_cast %398 : vector<2xf32> to vector<2x1xf32>
    %400 = vector.extract_strided_slice %7 {offsets = [0, 3], sizes = [1, 1], strides = [1, 1]} : vector<1x12xf32> to vector<1x1xf32>
    %401 = vector.broadcast %400 : vector<1x1xf32> to vector<2x1xf32>
    %402 = arith.addf %399, %401 : vector<2x1xf32>
    %c0_20 = arith.constant 0 : index
    %c0_21 = arith.constant 0 : index
    %403 = vector.load %arg3[%c0_20, %c0_21] : memref<2x1xf32, #tpu.memory_space<vmem>>, vector<2x1xf32>
    tpu.vector_store %arg3[%c0_20, %c0_21], %402 {strides = array<i32>} : memref<2x1xf32, #tpu.memory_space<vmem>>, vector<2x1xf32>,
    return
  }
  func.func @transform_0(%arg0: i32) -> (i32, i32, i32) {
    %c0_i32 = arith.constant 0 : i32
    %c0_i32_0 = arith.constant 0 : i32
    %c0_i32_1 = arith.constant 0 : i32
    return %arg0, %c0_i32, %c0_i32_0 : i32, i32, i32
  }
  func.func @transform_1(%arg0: i32) -> (i32, i32) {
    %c0_i32 = arith.constant 0 : i32
    %c0_i32_0 = arith.constant 0 : i32
    %c0_i32_1 = arith.constant 0 : i32
    return %c0_i32, %c0_i32_0 : i32, i32
  }
  func.func @transform_2(%arg0: i32) -> (i32, i32) {
    %c0_i32 = arith.constant 0 : i32
    %c0_i32_0 = arith.constant 0 : i32
    return %arg0, %c0_i32 : i32, i32
  }
}

</mosaic_0001>

<bundles_post_ra>
// kernel: tpu_custom_call.1
= control target key start
LH: loop header
LB: loop body
LE: loop exit
PB: predicated region body
PF: predicated region fallthrough
CT: control target
= control target key end

     0   :  { %7 = vsyncpa [#allocation3], 0  ;;  %s781_s0 = inlined_call_operand.hbm [shape: f32[1,2,4], index: 0, kind: input, shape index: {}]   ;;  %s782_s1 = inlined_call_operand.hbm [shape: f32[13,12], index: 1, kind: input, shape index: {}]   ;;  %s783_s2 = inlined_call_operand.vmem [shape: f32[2,1], index: 2, kind: output, shape index: {}]  }
   0x1   :  { %8 = vsyncpa [#allocation5], 0  ;;  %s579_s9 = smov [#allocation2]   ;;  %s580_s11 = smov [#allocation4]  }
   0x2   :  { %s15_s10 = sshll.u32 %s579_s9, 4  ;;  %s24_s12 = sshll.u32 %s580_s11, 4  ;;  %s16_s10 = int_to_ptr.vmem [resolvable:$true] %s15_s10  ;;  %s608_s12 = int_to_ptr.vmem [resolvable:$true] %s24_s12 }
   0x3   :  { %s531_s15 = scalar_lea.hbm %s781_s0, 32 }
   0x4   :  { %p532_p0 = scmp.ne.s32.totalorder %s781_s0, %s531_s15  ;;  %p535_p1 = scmp.lt.u32.totalorder %s531_s15, %s781_s0 }
   0x6   :  { %p537_p2 = pnand %p535_p1, %p532_p0 }
   0x8   :  { %540 = shalt.err (!%p537_p2)
}
   0x9   :  { %s541_s20 = scalar_lea.vmem %s16_s10, 32  ;;  %p546_p4 = scmp.lt.s32.totalorder %s16_s10, %s16_s10 }
   0xa   :  { %p542_p3 = scmp.ne.s32.totalorder %s16_s10, %s541_s20  ;;  %p547_p5 = scmp.lt.s32.totalorder %s541_s20, %s541_s20 }
   0xc   :  { %p548_p6 = por %p547_p5, %p546_p4 }
   0xe   :  { %p549_p7 = pnand %p548_p6, %p542_p3 }
  0x10   :  { %552 = shalt.err (!%p549_p7)
}
  0x11   :  { %18 = dma.hbm_to_vmem [thread:$0]  %s781_s0, 32, %s16_s10, [#allocation3]  }
  0x12   :  { %s553_s25 = scalar_lea.hbm %s782_s1, 256 }
  0x13   :  { %p554_p8 = scmp.ne.s32.totalorder %s782_s1, %s553_s25  ;;  %p557_p9 = scmp.lt.u32.totalorder %s553_s25, %s782_s1 }
  0x15   :  { %p559_p10 = pnand %p557_p9, %p554_p8 }
  0x17   :  { %562 = shalt.err (!%p559_p10)
}
  0x18   :  { %s563_s30 = scalar_lea.vmem %s608_s12, 256  ;;  %p568_p12 = scmp.lt.s32.totalorder %s608_s12, %s608_s12 }
  0x19   :  { %p564_p11 = scmp.ne.s32.totalorder %s608_s12, %s563_s30  ;;  %p569_p13 = scmp.lt.s32.totalorder %s563_s30, %s563_s30 }
  0x1b   :  { %p570_p0 = por %p569_p13, %p568_p12 }
  0x1d   :  { %p571_p1 = pnand %p570_p0, %p564_p11 }
  0x1f   :  { %574 = shalt.err (!%p571_p1)
}
  0x20   :  { %s581_s0 = smov 128   ;;  %s582_s3 = smov 8  }
  0x21   :  { %30 = dma.hbm_to_vmem [thread:$0]  %s782_s1, 256, %s608_s12, [#allocation5], %s581_s0, %s581_s0, %s582_s3  }
  0x22   :  { %575 = dma.done.wait [#allocation3], 32  }
  0x23   :  { %576 = vsyncadd [#allocation3], 4294967264 }
  0x24   :  { %577 = dma.done.wait [#allocation5], 256  }
  0x25   :  { %578 = vsyncadd [#allocation5], 4294967040  ;;  %v40_v0 = vlaneseq  ;;  %v39_v4 = vld [vmem:[#allocation2] sm:$0x3]  ;;  %v37_v11 = vld [vmem:[#allocation4] sm:$0xff]  ;;  %vm128_vm0 = vcmask 1041409  }
  0x26   :  { %v647_v12 = vld [vmem:[#allocation4 + $0x8] sm:$0x1f]  ;;  %vm131_vm1 = vcmask 1041408   ;;  %s583_s1 = smov 122   ;;  %v584_v61 = vmov 0.0   ;;  %s585_s6 = smov 3  }
  0x27   :  { %v639_v1 = vshrl.u32 %v40_v0, 7  ;;  %s588_s7 = smov 6   ;;  %s590_s8 = smov 9   ;;  %vm447_vm2 = vcmask 17408   ;;  %vm456_vm3 = vcmask 1024  }
  0x28   :  { %s591_s9 = smov 119   ;;  %s592_s10 = smov 125  }
  0x29   :  { %v49_v2 = vsub.s32 1, %v639_v1  ;;  %v42_v3 = vsub.s32 0, %v639_v1  ;;  %v68_v7 = vsub.s32 5, %v639_v1  ;;  %v73_v8 = vsub.s32 6, %v639_v1 }
  0x2a   :  { %v85_v9 = vsub.s32 3, %v639_v1  ;;  %v101_v10 = vsub.s32 2, %v639_v1  ;;  %v79_v13 = vsub.s32 7, %v639_v1  ;;  %v119_v16 = vsub.s32 4, %v639_v1 }
  0x2b   :  { %v50_v5 = vrot.slane %v39_v4, %v49_v2  ;;  %v43_v6 = vrot.slane %v39_v4, %v42_v3  ;;  %v650_v14 = vrot.slane %v37_v11, %v68_v7  ;;  %v652_v15 = vrot.slane %v37_v11, %v73_v8 }
  0x2c   :  { %v655_v17 = vrot.slane %v37_v11, %v101_v10  ;;  %v657_v18 = vrot.slane %v37_v11, %v85_v9  ;;  %v660_v19 = vrot.slane %v647_v12, %v49_v2  ;;  %v663_v20 = vrot.slane %v647_v12, %v42_v3 }
  0x2d   :  { %52 = vbcast.lane.b32.xlu0 %v50_v5, 256  ;;  %v665_v21 = vrot.slane %v37_v11, %v79_v13  ;;  %v70_v22 = vmul.f32 0.0, %v650_v14  ;;  %v75_v23 = vmul.f32 0.0, %v652_v15  ;;  %v673_v26 = vrot.slane %v37_v11, %v119_v16 }
  0x2e   :  { %v110_v24 = vmul.f32 0.0, %v655_v17  ;;  %v115_v25 = vmul.f32 0.0, %v657_v18  ;;  %v676_v27 = vrot.slane %v647_v12, %v101_v10  ;;  %v97_v28 = vmul.f32 0.0, %v660_v19 }
  0x2f   :  { %v92_v29 = vmul.f32 0.0, %v663_v20  ;;  %v76_v30 = vadd.f32 %v75_v23, %v70_v22  ;;  %v81_v31 = vmul.f32 0.0, %v665_v21  ;;  %v57_v32 = vrot.slane %v37_v11, %v42_v3 }
  0x30   :  { %v116_v33 = vadd.f32 %v115_v25, %v110_v24  ;;  %v121_v34 = vmul.f32 0.0, %v673_v26  ;;  %v63_v35 = vrot.slane %v37_v11, %v49_v2  ;;  %v683_v36 = vrot.slane %v647_v12, %v85_v9 }
  0x31   :  { %45 = vbcast.lane.b32.xlu0 %v43_v6, 256  ;;  %v98_v37 = vadd.f32 %v97_v28, %v92_v29  ;;  %v103_v38 = vmul.f32 0.0, %v676_v27  ;;  %v82_v40 = vadd.f32 %v81_v31, %v76_v30  ;;  %v586_v5 = vmov 10  }
  0x32   :  { %v122_v42 = vadd.f32 %v121_v34, %v116_v33  ;;  %489 = vset.pattern.permute.xlu1 %v586_v5  ;;  %v587_v6 = vmov 9   ;;  %v589_v10 = vmov 11  }
  0x33   :  { %v688_v44 = vadd.f32 %v103_v38, %v98_v37  ;;  %v87_v46 = vadd.f32 %v683_v36, %v82_v40  ;;  %488 = vset.pattern.permute.xlu0 %v587_v6 }
  0x35   :  { %v105_v50 = vadd.f32 %v688_v44, %v87_v46 }
  0x9f   :  { %v53_v39 = vpop.permute.xlu0 %52 }
  0xa0   :  { %v59_v41 = vmul.f32 %v57_v32, %v53_v39 }
  0xa2   :  { %v686_v43 = vadd.f32 %v63_v35, %v59_v41 }
  0xa3   :  { %v46_v45 = vpop.permute.xlu0 %45 }
  0xa4   :  { %v124_v47 = vadd.f32 %v122_v42, %v686_v43  ;;  %v58_v48 = vmul.f32 %v57_v32, %v46_v45 }
  0xa6   :  { %v692_v49 = vadd.f32 %v63_v35, %v58_v48  ;;  %v127_v51 = vrot.slane %v124_v47, 7 }
  0xa8   :  { %v123_v52 = vadd.f32 %v122_v42, %v692_v49 }
  0xaa   :  { %v129_v53 = vsel %vm128_vm0, %v127_v51, %v123_v52 }
  0xab   :  { %v132_v54 = vsel %vm131_vm1, %v129_v53, %v105_v50 }
  0xac   :  { %v464_v55 = vmul.f32 -1.442695, %v132_v54 }
  0xae   :  { %501 = vpow2.f32 %v464_v55 }
  0xb8   :  { %v502_v56 = vpop.eup %501 }
  0xb9   :  { %v136_v57 = vadd.f32 1.0, %v502_v56 }
  0xbb   :  { %503 = vrcp.f32 %v136_v57 }
  0xc5   :  { %v504_v58 = vpop.eup %503 }
  0xc6   :  { %v139_v59 = vmul.f32 2.0, %v504_v58 }
  0xc8   :  { %v465_v60 = vadd.f32 -1.0, %v139_v59 }
  0xca   :  { %147 = vrot.lane.b32.xlu1 %v465_v60, %s583_s1 }
  0xce   :  { %142 = vrot.lane.b32.xlu1 %v584_v61, %s585_s6 }
 0x13c   :  { %v148_v62 = vpop.permute.xlu1 %147 }
 0x13d   :  { %v150_v63 = vmul.f32 %v504_v58, %v148_v62 }
 0x13f   :  { %152 = vrot.lane.b32.xlu0 %v150_v63, %s585_s6 }
 0x140   :  { %v143_v0 = vpop.permute.xlu1 %142 }
 0x141   :  { %v145_v2 = vmul.f32 %v504_v58, %v143_v0 }
 0x1b1   :  { %v153_v3 = vpop.permute.xlu0 %152 }
 0x1b2   :  { %v155_v4 = vadd.f32 %v153_v3, %v145_v2 }
 0x1b4   :  { %505 = vtanh.f32 %v155_v4  ;;  %v202_v55 = vsel %vm131_vm1, %v155_v4, 0.0 }
 0x1be   :  { %v506_v7 = vpop.eup %505 }
 0x1bf   :  { %158 = vrot.lane.b32.xlu1 %v506_v7, %s588_s7 }
 0x231   :  { %v159_v8 = vpop.permute.xlu1 %158 }
 0x232   :  { %v161_v9 = vmul.f32 %v504_v58, %v159_v8 }
 0x234   :  { %169 = vperm.xlu1 %489, %v161_v9   ;;  %164 = vperm.xlu0 %488, %v161_v9  }
 0x238   :  { %490 = vset.pattern.permute.xlu1 %v589_v10  ;;  %492 = vset.pattern.permute.xlu0 %v586_v5 }
 0x239   :  { %175 = vperm.xlu1 %490, %v161_v9  }
 0x23d   :  { %491 = vset.pattern.permute.xlu1 %v587_v6 }
 0x2b3   :  { %v170_v11 = vpop.permute.xlu1 %169  ;;  %v165_v13 = vpop.permute.xlu0 %164 }
 0x2b4   :  { %v172_v22 = vmul.f32 %v170_v11, %v652_v15  ;;  %v183_v23 = vmul.f32 %v170_v11, %v657_v18  ;;  %v167_v24 = vmul.f32 %v165_v13, %v650_v14  ;;  %v182_v25 = vmul.f32 %v165_v13, %v655_v17 }
 0x2b6   :  { %v173_v29 = vadd.f32 %v172_v22, %v167_v24  ;;  %v184_v30 = vadd.f32 %v183_v23, %v182_v25 }
 0x2b8   :  { %v176_v28 = vpop.permute.xlu1 %175 }
 0x2b9   :  { %v178_v31 = vmul.f32 %v176_v28, %v665_v21  ;;  %v185_v32 = vmul.f32 %v176_v28, %v673_v26 }
 0x2bb   :  { %v179_v33 = vadd.f32 %v178_v31, %v173_v29  ;;  %v186_v34 = vadd.f32 %v185_v32, %v184_v30 }
 0x2bd   :  { %v180_v35 = vadd.f32 %v179_v33, %v683_v36  ;;  %v188_v37 = vrot.slane %v186_v34, 7  ;;  %v192_v40 = vadd.f32 %v186_v34, %v686_v43 }
 0x2bf   :  { %v181_v38 = vadd.f32 %v180_v35, %v688_v44  ;;  %v191_v39 = vadd.f32 %v188_v37, %v692_v49 }
 0x2c1   :  { %v195_v41 = vrot.slane %v191_v39, 1  ;;  %v199_v42 = vrot.slane %v181_v38, 6 }
 0x2c3   :  { %v196_v45 = vsel %vm128_vm0, %v192_v40, %v195_v41 }
 0x2c4   :  { %v201_v46 = vsel %vm131_vm1, %v196_v45, %v199_v42 }
 0x2c5   :  { %v466_v47 = vmul.f32 -1.442695, %v201_v46 }
 0x2c7   :  { %507 = vpow2.f32 %v466_v47 }
 0x2d1   :  { %v508_v48 = vpop.eup %507 }
 0x2d2   :  { %v206_v50 = vadd.f32 1.0, %v508_v48 }
 0x2d4   :  { %509 = vrcp.f32 %v206_v50 }
 0x2de   :  { %v510_v51 = vpop.eup %509 }
 0x2df   :  { %v209_v52 = vmul.f32 2.0, %v510_v51  ;;  %v211_v56 = vmul.f32 %v510_v51, %v202_v55 }
 0x2e1   :  { %v467_v53 = vadd.f32 -1.0, %v209_v52 }
 0x2e3   :  { %213 = vrot.lane.b32.xlu0 %v467_v53, %s583_s1 }
 0x355   :  { %v214_v44 = vpop.permute.xlu0 %213 }
 0x356   :  { %v216_v54 = vmul.f32 %v510_v51, %v214_v44 }
 0x358   :  { %218 = vrot.lane.b32.xlu1 %v216_v54, %s585_s6 }
 0x3ca   :  { %v219_v57 = vpop.permute.xlu1 %218 }
 0x3cb   :  { %v221_v58 = vadd.f32 %v219_v57, %v211_v56 }
 0x3cd   :  { %511 = vtanh.f32 %v221_v58 }
 0x3d7   :  { %v512_v59 = vpop.eup %511 }
 0x3d8   :  { %224 = vrot.lane.b32.xlu0 %v512_v59, %s588_s7 }
 0x44a   :  { %v225_v60 = vpop.permute.xlu0 %224 }
 0x44b   :  { %v227_v61 = vmul.f32 %v510_v51, %v225_v60 }
 0x44d   :  { %235 = vperm.xlu0 %492, %v227_v61   ;;  %230 = vperm.xlu1 %491, %v227_v61  }
 0x451   :  { %493 = vset.pattern.permute.xlu1 %v589_v10  ;;  %494 = vset.pattern.permute.xlu0 %v587_v6 }
 0x452   :  { %241 = vperm.xlu1 %493, %v227_v61  }
 0x456   :  { %495 = vset.pattern.permute.xlu1 %v586_v5 }
 0x4cc   :  { %v236_v62 = vpop.permute.xlu0 %235  ;;  %v231_v63 = vpop.permute.xlu1 %230 }
 0x4cd   :  { %v238_v0 = vmul.f32 %v236_v62, %v652_v15  ;;  %v248_v2 = vmul.f32 %v236_v62, %v660_v19  ;;  %v233_v3 = vmul.f32 %v231_v63, %v650_v14  ;;  %v257_v4 = vmul.f32 %v236_v62, %v657_v18 }
 0x4ce   :  { %v247_v7 = vmul.f32 %v231_v63, %v663_v20  ;;  %v256_v8 = vmul.f32 %v231_v63, %v655_v17 }
 0x4cf   :  { %v239_v9 = vadd.f32 %v238_v0, %v233_v3 }
 0x4d0   :  { %v249_v11 = vadd.f32 %v248_v2, %v247_v7  ;;  %v258_v22 = vadd.f32 %v257_v4, %v256_v8 }
 0x4d1   :  { %v242_v13 = vpop.permute.xlu1 %241 }
 0x4d2   :  { %v244_v23 = vmul.f32 %v242_v13, %v665_v21  ;;  %v250_v24 = vmul.f32 %v242_v13, %v676_v27  ;;  %v259_v25 = vmul.f32 %v242_v13, %v673_v26 }
 0x4d4   :  { %v245_v28 = vadd.f32 %v244_v23, %v239_v9  ;;  %v251_v29 = vadd.f32 %v250_v24, %v249_v11  ;;  %v260_v30 = vadd.f32 %v259_v25, %v258_v22 }
 0x4d6   :  { %v246_v31 = vadd.f32 %v245_v28, %v683_v36  ;;  %v253_v32 = vrot.slane %v251_v29, 2  ;;  %v262_v33 = vrot.slane %v260_v30, 6  ;;  %v263_v34 = vrot.slane %v260_v30, 7 }
 0x4d8   :  { %v255_v35 = vadd.f32 %v253_v32, %v246_v31  ;;  %v266_v37 = vadd.f32 %v262_v33, %v692_v49  ;;  %v267_v38 = vadd.f32 %v263_v34, %v686_v43 }
 0x4da   :  { %v270_v39 = vrot.slane %v266_v37, 2  ;;  %v271_v40 = vrot.slane %v267_v38, 1  ;;  %v275_v41 = vrot.slane %v255_v35, 6 }
 0x4dc   :  { %v272_v42 = vsel %vm128_vm0, %v271_v40, %v270_v39 }
 0x4dd   :  { %v277_v45 = vsel %vm131_vm1, %v272_v42, %v275_v41 }
 0x4de   :  { %v468_v46 = vmul.f32 -1.442695, %v277_v45 }
 0x4e0   :  { %513 = vpow2.f32 %v468_v46 }
 0x4ea   :  { %v514_v47 = vpop.eup %513 }
 0x4eb   :  { %v281_v48 = vadd.f32 1.0, %v514_v47 }
 0x4ed   :  { %515 = vrcp.f32 %v281_v48 }
 0x4f7   :  { %v516_v50 = vpop.eup %515 }
 0x4f8   :  { %v284_v51 = vmul.f32 2.0, %v516_v50  ;;  %v286_v54 = vmul.f32 %v516_v50, %v221_v58 }
 0x4fa   :  { %v469_v52 = vadd.f32 -1.0, %v284_v51 }
 0x4fc   :  { %288 = vrot.lane.b32.xlu1 %v469_v52, %s583_s1 }
 0x56e   :  { %v289_v53 = vpop.permute.xlu1 %288 }
 0x56f   :  { %v291_v44 = vmul.f32 %v516_v50, %v289_v53 }
 0x571   :  { %293 = vrot.lane.b32.xlu0 %v291_v44, %s585_s6 }
 0x5e3   :  { %v294_v55 = vpop.permute.xlu0 %293 }
 0x5e4   :  { %v296_v56 = vadd.f32 %v294_v55, %v286_v54 }
 0x5e6   :  { %517 = vtanh.f32 %v296_v56 }
 0x5f0   :  { %v518_v57 = vpop.eup %517 }
 0x5f1   :  { %299 = vrot.lane.b32.xlu1 %v518_v57, %s588_s7 }
 0x663   :  { %v300_v59 = vpop.permute.xlu1 %299 }
 0x664   :  { %v302_v60 = vmul.f32 %v516_v50, %v300_v59 }
 0x666   :  { %310 = vperm.xlu1 %495, %v302_v60   ;;  %305 = vperm.xlu0 %494, %v302_v60  }
 0x66a   :  { %496 = vset.pattern.permute.xlu1 %v589_v10  ;;  %498 = vset.pattern.permute.xlu0 %v586_v5 }
 0x66b   :  { %316 = vperm.xlu1 %496, %v302_v60  }
 0x66f   :  { %497 = vset.pattern.permute.xlu1 %v587_v6 }
 0x6e5   :  { %v311_v61 = vpop.permute.xlu1 %310  ;;  %v306_v62 = vpop.permute.xlu0 %305 }
 0x6e6   :  { %v313_v58 = vmul.f32 %v311_v61, %v652_v15  ;;  %v323_v63 = vmul.f32 %v311_v61, %v660_v19  ;;  %v308_v0 = vmul.f32 %v306_v62, %v650_v14  ;;  %v332_v2 = vmul.f32 %v311_v61, %v657_v18 }
 0x6e7   :  { %v322_v3 = vmul.f32 %v306_v62, %v663_v20  ;;  %v331_v4 = vmul.f32 %v306_v62, %v655_v17 }
 0x6e8   :  { %v314_v7 = vadd.f32 %v313_v58, %v308_v0 }
 0x6e9   :  { %v324_v8 = vadd.f32 %v323_v63, %v322_v3  ;;  %v333_v9 = vadd.f32 %v332_v2, %v331_v4 }
 0x6ea   :  { %v317_v5 = vpop.permute.xlu1 %316 }
 0x6eb   :  { %v319_v6 = vmul.f32 %v317_v5, %v665_v21  ;;  %v325_v11 = vmul.f32 %v317_v5, %v676_v27  ;;  %v334_v13 = vmul.f32 %v317_v5, %v673_v26 }
 0x6ed   :  { %v320_v22 = vadd.f32 %v319_v6, %v314_v7  ;;  %v326_v23 = vadd.f32 %v325_v11, %v324_v8  ;;  %v335_v24 = vadd.f32 %v334_v13, %v333_v9 }
 0x6ef   :  { %v321_v25 = vadd.f32 %v320_v22, %v683_v36  ;;  %v328_v18 = vrot.slane %v326_v23, 2  ;;  %v337_v28 = vrot.slane %v335_v24, 5  ;;  %v338_v29 = vrot.slane %v335_v24, 6 }
 0x6f1   :  { %v330_v30 = vadd.f32 %v328_v18, %v321_v25  ;;  %v341_v17 = vadd.f32 %v337_v28, %v692_v49  ;;  %v342_v31 = vadd.f32 %v338_v29, %v686_v43 }
 0x6f3   :  { %v345_v32 = vrot.slane %v341_v17, 3  ;;  %v346_v33 = vrot.slane %v342_v31, 2  ;;  %v350_v34 = vrot.slane %v330_v30, 6 }
 0x6f5   :  { %v347_v35 = vsel %vm128_vm0, %v346_v33, %v345_v32 }
 0x6f6   :  { %v352_v26 = vsel %vm131_vm1, %v347_v35, %v350_v34 }
 0x6f7   :  { %v470_v37 = vmul.f32 -1.442695, %v352_v26 }
 0x6f9   :  { %519 = vpow2.f32 %v470_v37 }
 0x703   :  { %v520_v38 = vpop.eup %519 }
 0x704   :  { %v356_v39 = vadd.f32 1.0, %v520_v38 }
 0x706   :  { %521 = vrcp.f32 %v356_v39 }
 0x710   :  { %v522_v40 = vpop.eup %521 }
 0x711   :  { %v359_v41 = vmul.f32 2.0, %v522_v40  ;;  %v361_v43 = vmul.f32 %v522_v40, %v296_v56 }
 0x713   :  { %v471_v42 = vadd.f32 -1.0, %v359_v41 }
 0x715   :  { %363 = vrot.lane.b32.xlu0 %v471_v42, %s583_s1 }
 0x787   :  { %v364_v49 = vpop.permute.xlu0 %363 }
 0x788   :  { %v366_v45 = vmul.f32 %v522_v40, %v364_v49 }
 0x78a   :  { %368 = vrot.lane.b32.xlu1 %v366_v45, %s585_s6 }
 0x7fc   :  { %v369_v46 = vpop.permute.xlu1 %368 }
 0x7fd   :  { %v371_v47 = vadd.f32 %v369_v46, %v361_v43 }
 0x7ff   :  { %523 = vtanh.f32 %v371_v47 }
 0x809   :  { %v524_v48 = vpop.eup %523 }
 0x80a   :  { %374 = vrot.lane.b32.xlu0 %v524_v48, %s588_s7 }
 0x87c   :  { %v375_v50 = vpop.permute.xlu0 %374 }
 0x87d   :  { %v377_v51 = vmul.f32 %v522_v40, %v375_v50 }
 0x87f   :  { %385 = vperm.xlu0 %498, %v377_v51   ;;  %380 = vperm.xlu1 %497, %v377_v51  }
 0x883   :  { %499 = vset.pattern.permute.xlu1 %v589_v10  ;;  %500 = vset.pattern.permute.xlu0 %v589_v10 }
 0x884   :  { %391 = vperm.xlu1 %499, %v377_v51  }
 0x8fe   :  { %v386_v52 = vpop.permute.xlu0 %385  ;;  %v381_v53 = vpop.permute.xlu1 %380 }
 0x8ff   :  { %v388_v44 = vmul.f32 %v386_v52, %v652_v15  ;;  %v398_v54 = vmul.f32 %v386_v52, %v660_v19  ;;  %v383_v55 = vmul.f32 %v381_v53, %v650_v14  ;;  %v397_v56 = vmul.f32 %v381_v53, %v663_v20 }
 0x901   :  { %v389_v59 = vadd.f32 %v388_v44, %v383_v55  ;;  %v399_v60 = vadd.f32 %v398_v54, %v397_v56 }
 0x903   :  { %v392_v57 = vpop.permute.xlu1 %391 }
 0x904   :  { %v394_v61 = vmul.f32 %v392_v57, %v665_v21  ;;  %v400_v62 = vmul.f32 %v392_v57, %v676_v27  ;;  %v437_v27 = vrot.slane %v647_v12, %v119_v16 }
 0x906   :  { %v395_v58 = vadd.f32 %v394_v61, %v389_v59  ;;  %v401_v10 = vadd.f32 %v400_v62, %v399_v60 }
 0x908   :  { %v396_v63 = vadd.f32 %v395_v58, %v683_v36  ;;  %v403_v0 = vrot.slane %v401_v10, 2  ;;  %v415_v36 = vrot.slane %v371_v47, 2 }
 0x90a   :  { %v405_v2 = vadd.f32 %v403_v0, %v396_v63 }
 0x90c   :  { %v472_v15 = vmul.f32 -1.442695, %v405_v2 }
 0x90e   :  { %525 = vpow2.f32 %v472_v15 }
 0x918   :  { %v526_v19 = vpop.eup %525 }
 0x919   :  { %v409_v3 = vadd.f32 1.0, %v526_v19 }
 0x91b   :  { %527 = vrcp.f32 %v409_v3 }
 0x925   :  { %v528_v14 = vpop.eup %527 }
 0x926   :  { %v412_v20 = vmul.f32 2.0, %v528_v14  ;;  %v417_v8 = vmul.f32 %v528_v14, %v415_v36 }
 0x928   :  { %v473_v4 = vadd.f32 -1.0, %v412_v20 }
 0x92a   :  { %419 = vrot.lane.b32.xlu1 %v473_v4, %s583_s1 }
 0x99c   :  { %v420_v7 = vpop.permute.xlu1 %419 }
 0x99d   :  { %v422_v21 = vmul.f32 %v528_v14, %v420_v7 }
 0x99f   :  { %424 = vrot.lane.b32.xlu0 %v422_v21, %s585_s6 }
 0x9a3   :  { %439 = vrot.lane.b32.xlu0 %v437_v27, %s590_s8 }
 0xa11   :  { %v425_v5 = vpop.permute.xlu0 %424 }
 0xa12   :  { %v427_v9 = vadd.f32 %v425_v5, %v417_v8 }
 0xa14   :  { %529 = vtanh.f32 %v427_v9 }
 0xa15   :  { %v440_v13 = vpop.permute.xlu0 %439 }
 0xa1e   :  { %v530_v6 = vpop.eup %529 }
 0xa1f   :  { %430 = vrot.lane.b32.xlu1 %v530_v6, %s588_s7 }
 0xa91   :  { %v431_v11 = vpop.permute.xlu1 %430 }
 0xa92   :  { %v433_v22 = vmul.f32 %v528_v14, %v431_v11 }
 0xa94   :  { %v442_v23 = vmul.f32 %v440_v13, %v433_v22 }
 0xa96   :  { %444 = vrot.lane.b32.xlu1 %v442_v23, %s591_s9 }
 0xb08   :  { %v445_v1 = vpop.permute.xlu1 %444 }
 0xb09   :  { %v448_v24 = vsel %vm447_vm2, %v445_v1, 0.0 }
 0xb0a   :  { %449 = vadd.xlane.f32.xlu0 %v448_v24 }
 0xb97   :  { %v450_v12 = vpop.xlane.xlu0 %449 }
 0xb98   :  { %v451_v16 = vadd.f32 %v450_v12, %v437_v27 }
 0xb9a   :  { %453 = vrot.lane.b32.xlu1 %v451_v16, %s592_s10 }
 0xc0c   :  { %v454_v25 = vpop.permute.xlu1 %453 }
 0xc0d   :  { %457 = vst.msk [vmem:[%s783_s2] sm:$0x3] %vm456_vm3, %v454_v25 }
 0xc0e   :  { %462 = vsyncpa [#allocation3], 1 }
 0xc0f   :  { %463 = vsyncpa [#allocation5], 1 }

</bundles_post_ra>
